<compile_context>
chip_gen: v5e
topology: v5e:2x2
jax: 0.10.0
libtpu: 0.0.40
codegen_flags: <defaults>
</compile_context>

<pallas_src>
import jax
import jax.numpy as jnp
from jax.experimental import pallas as pl
from jax.experimental.pallas import tpu as pltpu

EPS = 1e-5

INPUT_SHAPE = 3023   # matches `input_shape = 3023` in the reference script
NUM_ACTIONS = 10     # small action-space size consistent with gen4 battles
HIDDEN = 64
BATCH = 8

K_PAD = 3072         # layer-1 contraction length, padded to a multiple of 128 lanes

# Rows of the packed (8, HIDDEN) f32 vector slab.
_ROW_B1, _ROW_G1, _ROW_BE1, _ROW_B2, _ROW_G2, _ROW_BE2, _ROW_B3 = range(7)


def policy_kernel(x_ref, w1_ref, vec_ref, wmat_ref, out_ref, xb_ref):
    # ---- stage x: cast f32 -> bf16 and zero-pad K from 3023 to 3072 in VMEM ----
    xb_ref[...] = jnp.zeros_like(xb_ref)
    xb_ref[:, :INPUT_SHAPE] = x_ref[...].astype(jnp.bfloat16)

    # ---- Linear(3023, 64): bf16 MXU, f32 accumulation, canonical (M,K)x(K,N) ----
    h = jnp.dot(xb_ref[...], w1_ref[...], preferred_element_type=jnp.float32)

    # unpack the tiny-parameter slabs (static sub-vreg slices, no data movement)
    b1 = vec_ref[_ROW_B1:_ROW_B1 + 1, :]
    g1 = vec_ref[_ROW_G1:_ROW_G1 + 1, :]
    be1 = vec_ref[_ROW_BE1:_ROW_BE1 + 1, :]
    b2 = vec_ref[_ROW_B2:_ROW_B2 + 1, :]
    g2 = vec_ref[_ROW_G2:_ROW_G2 + 1, :]
    be2 = vec_ref[_ROW_BE2:_ROW_BE2 + 1, :]
    b3 = vec_ref[_ROW_B3:_ROW_B3 + 1, :NUM_ACTIONS]
    w2 = wmat_ref[:HIDDEN, :]
    w3p = wmat_ref[HIDDEN:, :]          # (H, H), only first NUM_ACTIONS cols nonzero

    # ---- bias + ReLU, BatchNorm1d(64) (training mode, two-pass batch stats) ----
    h = jnp.maximum(h + b1, 0.0)
    mu = jnp.mean(h, axis=0, keepdims=True)
    d = h - mu
    var = jnp.mean(d * d, axis=0, keepdims=True)
    h = d * jax.lax.rsqrt(var + EPS) * g1 + be1

    # ---- Linear(64, 64) + ReLU, BatchNorm1d(64) ----
    h = jnp.maximum(jnp.dot(h, w2, preferred_element_type=jnp.float32) + b2, 0.0)
    mu = jnp.mean(h, axis=0, keepdims=True)
    d = h - mu
    var = jnp.mean(d * d, axis=0, keepdims=True)
    h = d * jax.lax.rsqrt(var + EPS) * g2 + be2

    # ---- Linear(64, num_actions) + Softmax(dim=-1) ----
    logits = jnp.dot(h, w3p, preferred_element_type=jnp.float32)[:, :NUM_ACTIONS] + b3
    m = jnp.max(logits, axis=-1, keepdims=True)
    e = jnp.exp(logits - m)
    s = jnp.sum(e, axis=-1, keepdims=True)
    inv = pl.reciprocal(s, approx=True)      # EUP slot (essentially free)
    inv = inv * (2.0 - s * inv)              # one Newton step -> full f32 precision
    out_ref[...] = e * inv


def policy_network(x, params):
    """x: (B, INPUT_SHAPE) float32 -> (B, NUM_ACTIONS) softmax probabilities.

    Single grid-less pallas_call; the whole batch stays in one block because
    train-mode BatchNorm needs full-batch statistics.  Total VMEM footprint at
    B=8 is ~0.6 MiB, far under every generation's scoped limit.
    """
    B, F = x.shape
    assert F == INPUT_SHAPE
    assert B % 8 == 0, "keep batch a multiple of 8 sublanes"
    w1, vecs, wmat = params

    vmem = pl.BlockSpec(memory_space=pltpu.MemorySpace.VMEM)
    return pl.pallas_call(
        policy_kernel,
        out_shape=jax.ShapeDtypeStruct((B, NUM_ACTIONS), jnp.float32),
        in_specs=[vmem, vmem, vmem, vmem],
        out_specs=vmem,
        scratch_shapes=[pltpu.VMEM((B, K_PAD), jnp.bfloat16)],  # bf16 padded-x staging
    )(x, w1, vecs, wmat)


def init_params(key):
    """Deterministic PyTorch-style init (uniform +/- 1/sqrt(fan_in)), packed for DMA.

    Returns:
      w1   : (K_PAD, HIDDEN) bf16, zero rows beyond INPUT_SHAPE (lane-dense, (K,N))
      vecs : (8, HIDDEN) f32 slab: rows = b1, gamma1, beta1, b2, gamma2, beta2,
             b3 (zero-padded to HIDDEN), unused
      wmat : (2*HIDDEN, HIDDEN) f32 slab: rows 0:H = w2, rows H:2H = w3 zero-padded
    """
    ks = jax.random.split(key, 6)

    def linear(kw, kb, fan_in, fan_out):
        bound = 1.0 / jnp.sqrt(jnp.float32(fan_in))
        w = jax.random.uniform(kw, (fan_in, fan_out), jnp.float32, -bound, bound)
        b = jax.random.uniform(kb, (fan_out,), jnp.float32, -bound, bound)
        return w, b

    w1f, b1 = linear(ks[0], ks[1], INPUT_SHAPE, HIDDEN)       # (F, H)
    w2, b2 = linear(ks[2], ks[3], HIDDEN, HIDDEN)             # (H, H)
    w3, b3 = linear(ks[4], ks[5], HIDDEN, NUM_ACTIONS)        # (H, A)

    w1 = jnp.zeros((K_PAD, HIDDEN), jnp.bfloat16)
    w1 = w1.at[:INPUT_SHAPE, :].set(w1f.astype(jnp.bfloat16))

    vecs = jnp.zeros((8, HIDDEN), jnp.float32)
    vecs = vecs.at[_ROW_B1].set(b1)
    vecs = vecs.at[_ROW_G1].set(jnp.ones((HIDDEN,), jnp.float32))   # BN gamma = 1
    vecs = vecs.at[_ROW_B2].set(b2)
    vecs = vecs.at[_ROW_G2].set(jnp.ones((HIDDEN,), jnp.float32))   # BN gamma = 1
    vecs = vecs.at[_ROW_B3, :NUM_ACTIONS].set(b3)
    # beta1 / beta2 rows stay zero (PyTorch default).

    wmat = jnp.zeros((2 * HIDDEN, HIDDEN), jnp.float32)
    wmat = wmat.at[:HIDDEN, :].set(w2)
    wmat = wmat.at[HIDDEN:, :NUM_ACTIONS].set(w3)

    return (w1, vecs, wmat)


def reference_forward(x, params):
    """Pure-JAX reference of the PyTorch forward (train-mode BatchNorm).

    Mirrors the kernel's bf16 layer-1 operands (the bf16 weight/input rounding is
    the one documented deviation from the f32 PyTorch module).
    """
    w1, vecs, wmat = params
    w1f = w1[:INPUT_SHAPE, :].astype(jnp.float32)             # (F, H), bf16-rounded
    b1, g1, be1 = vecs[_ROW_B1], vecs[_ROW_G1], vecs[_ROW_BE1]
    b2, g2, be2 = vecs[_ROW_B2], vecs[_ROW_G2], vecs[_ROW_BE2]
    b3 = vecs[_ROW_B3, :NUM_ACTIONS]
    w2 = wmat[:HIDDEN, :]
    w3 = wmat[HIDDEN:, :NUM_ACTIONS]
    xb = x.astype(jnp.bfloat16).astype(jnp.float32)

    def bn(h, g, b):
        mu = jnp.mean(h, axis=0, keepdims=True)
        var = jnp.mean((h - mu) ** 2, axis=0, keepdims=True)
        return (h - mu) / jnp.sqrt(var + EPS) * g + b

    h = jnp.maximum(xb @ w1f + b1, 0.0)
    h = bn(h, g1, be1)
    h = jnp.maximum(h @ w2 + b2, 0.0)
    h = bn(h, g2, be2)
    logits = h @ w3 + b3
    return jax.nn.softmax(logits, axis=-1)


if __name__ == "__main__":
    key = jax.random.PRNGKey(0)
    k_x, k_p = jax.random.split(key)

    # Battle-embedding-like input: (batch, 3023) float32
    x = jax.random.normal(k_x, (BATCH, INPUT_SHAPE), jnp.float32)
    params = init_params(k_p)

    out = jax.block_until_ready(policy_network(x, params))
    ref = reference_forward(x, params)

    assert out.shape == (BATCH, NUM_ACTIONS)
    assert bool(jnp.all(jnp.isfinite(out))), "non-finite probabilities"
    # tolerance accounts for bf16 weight storage / bf16 MXU layer-1 pass
    assert jnp.allclose(out, ref, atol=2e-3, rtol=2e-3), "mismatch vs pure-JAX reference"
    assert jnp.allclose(jnp.sum(out, axis=-1), 1.0, atol=1e-5), "softmax rows must sum to 1"

    print("KERNEL_OK")
</pallas_src>

<mosaic_0001>
module attributes {stable_mosaic.version = 11 : i64} {
  func.func @policy_kernel(%arg0: memref<8x3023xf32, #tpu.memory_space<vmem>>, %arg1: memref<3072x64xbf16, #tpu.memory_space<vmem>>, %arg2: memref<8x64xf32, #tpu.memory_space<vmem>>, %arg3: memref<128x64xf32, #tpu.memory_space<vmem>>, %arg4: memref<8x10xf32, #tpu.memory_space<vmem>>, %arg5: memref<8x3072xbf16, #tpu.memory_space<vmem>>) attributes {dimension_semantics = [], scalar_prefetch = 0 : i64, scratch_operands = 1 : i64, tpu.core_type = #tpu.core_type<tc>} {
    %cst = arith.constant 0.000000e+00 : bf16
    %0 = vector.broadcast %cst : bf16 to vector<8x3072xbf16>
    %c0 = arith.constant 0 : index
    %c0_0 = arith.constant 0 : index
    %1 = vector.load %arg5[%c0, %c0_0] : memref<8x3072xbf16, #tpu.memory_space<vmem>>, vector<8x3072xbf16>
    tpu.vector_store %arg5[%c0, %c0_0], %0 {strides = array<i32>} : memref<8x3072xbf16, #tpu.memory_space<vmem>>, vector<8x3072xbf16>,
    %c0_1 = arith.constant 0 : index
    %c0_2 = arith.constant 0 : index
    %2 = vector.load %arg0[%c0_1, %c0_2] : memref<8x3023xf32, #tpu.memory_space<vmem>>, vector<8x3023xf32>
    %3 = arith.truncf %2 : vector<8x3023xf32> to vector<8x3023xbf16>
    %c0_3 = arith.constant 0 : index
    %c0_4 = arith.constant 0 : index
    %4 = vector.load %arg5[%c0_3, %c0_4] : memref<8x3072xbf16, #tpu.memory_space<vmem>>, vector<8x3023xbf16>
    tpu.vector_store %arg5[%c0_3, %c0_4], %3 {strides = array<i32>} : memref<8x3072xbf16, #tpu.memory_space<vmem>>, vector<8x3023xbf16>,
    %c0_5 = arith.constant 0 : index
    %c0_6 = arith.constant 0 : index
    %5 = vector.load %arg5[%c0_5, %c0_6] : memref<8x3072xbf16, #tpu.memory_space<vmem>>, vector<8x3072xbf16>
    %c0_7 = arith.constant 0 : index
    %c0_8 = arith.constant 0 : index
    %6 = vector.load %arg1[%c0_7, %c0_8] : memref<3072x64xbf16, #tpu.memory_space<vmem>>, vector<3072x64xbf16>
    %cst_9 = arith.constant dense<0.000000e+00> : vector<8x64xf32>
    %7 = tpu.matmul %5, %6, %cst_9 {dimension_numbers = #tpu.dot_dimension_numbers<[1], [0], [0], [1], [0, 0, 1, 1], [], []>} : vector<8x3072xbf16>, vector<3072x64xbf16>, vector<8x64xf32> -> vector<8x64xf32>
    %c0_10 = arith.constant 0 : index
    %c0_11 = arith.constant 0 : index
    %8 = vector.load %arg2[%c0_10, %c0_11] : memref<8x64xf32, #tpu.memory_space<vmem>>, vector<1x64xf32>
    %c1 = arith.constant 1 : index
    %c0_12 = arith.constant 0 : index
    %9 = vector.load %arg2[%c1, %c0_12] : memref<8x64xf32, #tpu.memory_space<vmem>>, vector<1x64xf32>
    %c2 = arith.constant 2 : index
    %c0_13 = arith.constant 0 : index
    %10 = vector.load %arg2[%c2, %c0_13] : memref<8x64xf32, #tpu.memory_space<vmem>>, vector<1x64xf32>
    %c3 = arith.constant 3 : index
    %c0_14 = arith.constant 0 : index
    %11 = vector.load %arg2[%c3, %c0_14] : memref<8x64xf32, #tpu.memory_space<vmem>>, vector<1x64xf32>
    %c4 = arith.constant 4 : index
    %c0_15 = arith.constant 0 : index
    %12 = vector.load %arg2[%c4, %c0_15] : memref<8x64xf32, #tpu.memory_space<vmem>>, vector<1x64xf32>
    %c5 = arith.constant 5 : index
    %c0_16 = arith.constant 0 : index
    %13 = vector.load %arg2[%c5, %c0_16] : memref<8x64xf32, #tpu.memory_space<vmem>>, vector<1x64xf32>
    %c6 = arith.constant 6 : index
    %c0_17 = arith.constant 0 : index
    %14 = vector.load %arg2[%c6, %c0_17] : memref<8x64xf32, #tpu.memory_space<vmem>>, vector<1x10xf32>
    %c0_18 = arith.constant 0 : index
    %c0_19 = arith.constant 0 : index
    %15 = vector.load %arg3[%c0_18, %c0_19] : memref<128x64xf32, #tpu.memory_space<vmem>>, vector<64x64xf32>
    %c64 = arith.constant 64 : index
    %c0_20 = arith.constant 0 : index
    %16 = vector.load %arg3[%c64, %c0_20] : memref<128x64xf32, #tpu.memory_space<vmem>>, vector<64x64xf32>
    %17 = vector.broadcast %8 : vector<1x64xf32> to vector<8x64xf32>
    %18 = arith.addf %7, %17 : vector<8x64xf32>
    %cst_21 = arith.constant 0.000000e+00 : f32
    %19 = vector.broadcast %cst_21 : f32 to vector<8x64xf32>
    %20 = arith.maximumf %18, %19 : vector<8x64xf32>
    %cst_22 = arith.constant dense<0.000000e+00> : vector<64xf32>
    %21 = vector.multi_reduction <add>, %20, %cst_22 [0] : vector<8x64xf32> to vector<64xf32>
    %22 = vector.shape_cast %21 : vector<64xf32> to vector<1x64xf32>
    %cst_23 = arith.constant 8.000000e+00 : f32
    %23 = vector.broadcast %cst_23 : f32 to vector<1x64xf32>
    %24 = arith.divf %22, %23 : vector<1x64xf32>
    %25 = vector.broadcast %24 : vector<1x64xf32> to vector<8x64xf32>
    %26 = arith.subf %20, %25 : vector<8x64xf32>
    %27 = arith.mulf %26, %26 : vector<8x64xf32>
    %cst_24 = arith.constant dense<0.000000e+00> : vector<64xf32>
    %28 = vector.multi_reduction <add>, %27, %cst_24 [0] : vector<8x64xf32> to vector<64xf32>
    %29 = vector.shape_cast %28 : vector<64xf32> to vector<1x64xf32>
    %cst_25 = arith.constant 8.000000e+00 : f32
    %30 = vector.broadcast %cst_25 : f32 to vector<1x64xf32>
    %31 = arith.divf %29, %30 : vector<1x64xf32>
    %cst_26 = arith.constant 9.99999974E-6 : f32
    %32 = vector.broadcast %cst_26 : f32 to vector<1x64xf32>
    %33 = arith.addf %31, %32 : vector<1x64xf32>
    %34 = math.rsqrt %33 : vector<1x64xf32>
    %35 = vector.broadcast %34 : vector<1x64xf32> to vector<8x64xf32>
    %36 = arith.mulf %26, %35 : vector<8x64xf32>
    %37 = vector.broadcast %9 : vector<1x64xf32> to vector<8x64xf32>
    %38 = arith.mulf %36, %37 : vector<8x64xf32>
    %39 = vector.broadcast %10 : vector<1x64xf32> to vector<8x64xf32>
    %40 = arith.addf %38, %39 : vector<8x64xf32>
    %cst_27 = arith.constant dense<0.000000e+00> : vector<8x64xf32>
    %41 = tpu.matmul %40, %15, %cst_27 {dimension_numbers = #tpu.dot_dimension_numbers<[1], [0], [0], [1], [0, 0, 1, 1], [], []>} : vector<8x64xf32>, vector<64x64xf32>, vector<8x64xf32> -> vector<8x64xf32>
    %42 = vector.broadcast %11 : vector<1x64xf32> to vector<8x64xf32>
    %43 = arith.addf %41, %42 : vector<8x64xf32>
    %cst_28 = arith.constant 0.000000e+00 : f32
    %44 = vector.broadcast %cst_28 : f32 to vector<8x64xf32>
    %45 = arith.maximumf %43, %44 : vector<8x64xf32>
    %cst_29 = arith.constant dense<0.000000e+00> : vector<64xf32>
    %46 = vector.multi_reduction <add>, %45, %cst_29 [0] : vector<8x64xf32> to vector<64xf32>
    %47 = vector.shape_cast %46 : vector<64xf32> to vector<1x64xf32>
    %cst_30 = arith.constant 8.000000e+00 : f32
    %48 = vector.broadcast %cst_30 : f32 to vector<1x64xf32>
    %49 = arith.divf %47, %48 : vector<1x64xf32>
    %50 = vector.broadcast %49 : vector<1x64xf32> to vector<8x64xf32>
    %51 = arith.subf %45, %50 : vector<8x64xf32>
    %52 = arith.mulf %51, %51 : vector<8x64xf32>
    %cst_31 = arith.constant dense<0.000000e+00> : vector<64xf32>
    %53 = vector.multi_reduction <add>, %52, %cst_31 [0] : vector<8x64xf32> to vector<64xf32>
    %54 = vector.shape_cast %53 : vector<64xf32> to vector<1x64xf32>
    %cst_32 = arith.constant 8.000000e+00 : f32
    %55 = vector.broadcast %cst_32 : f32 to vector<1x64xf32>
    %56 = arith.divf %54, %55 : vector<1x64xf32>
    %cst_33 = arith.constant 9.99999974E-6 : f32
    %57 = vector.broadcast %cst_33 : f32 to vector<1x64xf32>
    %58 = arith.addf %56, %57 : vector<1x64xf32>
    %59 = math.rsqrt %58 : vector<1x64xf32>
    %60 = vector.broadcast %59 : vector<1x64xf32> to vector<8x64xf32>
    %61 = arith.mulf %51, %60 : vector<8x64xf32>
    %62 = vector.broadcast %12 : vector<1x64xf32> to vector<8x64xf32>
    %63 = arith.mulf %61, %62 : vector<8x64xf32>
    %64 = vector.broadcast %13 : vector<1x64xf32> to vector<8x64xf32>
    %65 = arith.addf %63, %64 : vector<8x64xf32>
    %cst_34 = arith.constant dense<0.000000e+00> : vector<8x64xf32>
    %66 = tpu.matmul %65, %16, %cst_34 {dimension_numbers = #tpu.dot_dimension_numbers<[1], [0], [0], [1], [0, 0, 1, 1], [], []>} : vector<8x64xf32>, vector<64x64xf32>, vector<8x64xf32> -> vector<8x64xf32>
    %67 = vector.extract_strided_slice %66 {offsets = [0, 0], sizes = [8, 10], strides = [1, 1]} : vector<8x64xf32> to vector<8x10xf32>
    %68 = vector.broadcast %14 : vector<1x10xf32> to vector<8x10xf32>
    %69 = arith.addf %67, %68 : vector<8x10xf32>
    %cst_35 = arith.constant dense<0xFF800000> : vector<8xf32>
    %70 = vector.multi_reduction <maximumf>, %69, %cst_35 [1] : vector<8x10xf32> to vector<8xf32>
    %71 = vector.shape_cast %70 : vector<8xf32> to vector<8x1xf32>
    %72 = vector.broadcast %71 : vector<8x1xf32> to vector<8x10xf32>
    %73 = arith.subf %69, %72 : vector<8x10xf32>
    %74 = math.exp %73 : vector<8x10xf32>
    %cst_36 = arith.constant dense<0.000000e+00> : vector<8xf32>
    %75 = vector.multi_reduction <add>, %74, %cst_36 [1] : vector<8x10xf32> to vector<8xf32>
    %76 = vector.shape_cast %75 : vector<8xf32> to vector<8x1xf32>
    %77 = tpu.reciprocal %76 {approx = true} : vector<8x1xf32> -> vector<8x1xf32>
    %78 = arith.mulf %76, %77 : vector<8x1xf32>
    %cst_37 = arith.constant 2.000000e+00 : f32
    %79 = vector.broadcast %cst_37 : f32 to vector<8x1xf32>
    %80 = arith.subf %79, %78 : vector<8x1xf32>
    %81 = arith.mulf %77, %80 : vector<8x1xf32>
    %82 = vector.broadcast %81 : vector<8x1xf32> to vector<8x10xf32>
    %83 = arith.mulf %74, %82 : vector<8x10xf32>
    %c0_38 = arith.constant 0 : index
    %c0_39 = arith.constant 0 : index
    %84 = vector.load %arg4[%c0_38, %c0_39] : memref<8x10xf32, #tpu.memory_space<vmem>>, vector<8x10xf32>
    tpu.vector_store %arg4[%c0_38, %c0_39], %83 {strides = array<i32>} : memref<8x10xf32, #tpu.memory_space<vmem>>, vector<8x10xf32>,
    return
  }
}

</mosaic_0001>

<bundles_post_ra>
// kernel: tpu_custom_call.1
= control target key start
LH: loop header
LB: loop body
LE: loop exit
PB: predicated region body
PF: predicated region fallthrough
CT: control target
= control target key end

     0   :  { %v3217_v32 = vmov 0   ;;  %s4016_s0 = inlined_call_operand.vmem [shape: f32[8,3023], index: 0, kind: input, shape index: {}]   ;;  %s4017_s1 = inlined_call_operand.vmem [shape: bf16[3072,64], index: 1, kind: input, shape index: {}]   ;;  %s4018_s2 = inlined_call_operand.vmem [shape: f32[8,64], index: 2, kind: input, shape index: {}]   ;;  %s4019_s3 = inlined_call_operand.vmem [shape: f32[128,64], index: 3, kind: input, shape index: {}]   ;;  %s4020_s4 = inlined_call_operand.hbm [shape: f32[8,10], index: 4, kind: output, shape index: {}]  }
   0x1   :  { %v2986_v0 = vld [vmem:[%s4017_s1 + $0x38] sm:$0xff]  ;;  %v2985_v4 = vld [vmem:[%s4017_s1 + $0x30] sm:$0xff]  ;;  %v2984_v8 = vld [vmem:[%s4017_s1 + $0x28] sm:$0xff]  ;;  %30 = vst [vmem:[#allocation2 + $0x58] sm:$0xff] %v3217_v32 }
   0x2   :  { %v2994_v1 = vld [vmem:[%s4017_s1 + $0x78] sm:$0xff]  ;;  %1738 = vmatpush.bf16.msra.mxu0 %v2986_v0  ;;  %v2993_v5 = vld [vmem:[%s4017_s1 + $0x70] sm:$0xff]  ;;  %v2992_v9 = vld [vmem:[%s4017_s1 + $0x68] sm:$0xff] }
   0x3   :  { %v3002_v2 = vld [vmem:[%s4017_s1 + $0xb8] sm:$0xff]  ;;  %1751 = vmatpush.bf16.msra.mxu1 %v2994_v1  ;;  %v3001_v6 = vld [vmem:[%s4017_s1 + $0xb0] sm:$0xff]  ;;  %v3000_v10 = vld [vmem:[%s4017_s1 + $0xa8] sm:$0xff] }
   0x4   :  { %v3010_v3 = vld [vmem:[%s4017_s1 + $0xf8] sm:$0xff]  ;;  %1764 = vmatpush.bf16.msra.mxu2 %v3002_v2  ;;  %v3009_v7 = vld [vmem:[%s4017_s1 + $0xf0] sm:$0xff]  ;;  %v3008_v11 = vld [vmem:[%s4017_s1 + $0xe8] sm:$0xff] }
   0x5   :  { %1777 = vmatpush.bf16.msra.mxu3 %v3010_v3  ;;  %v2983_v12 = vld [vmem:[%s4017_s1 + $0x20] sm:$0xff]  ;;  %v2982_v16 = vld [vmem:[%s4017_s1 + $0x18] sm:$0xff]  ;;  %v2981_v20 = vld [vmem:[%s4017_s1 + $0x10] sm:$0xff] }
   0x6   :  { %1739 = vmatpush.bf16.msra.mxu0 %v2985_v4  ;;  %v2991_v13 = vld [vmem:[%s4017_s1 + $0x60] sm:$0xff]  ;;  %v2990_v17 = vld [vmem:[%s4017_s1 + $0x58] sm:$0xff]  ;;  %v2989_v21 = vld [vmem:[%s4017_s1 + $0x50] sm:$0xff] }
   0x7   :  { %1752 = vmatpush.bf16.msra.mxu1 %v2993_v5  ;;  %v2999_v14 = vld [vmem:[%s4017_s1 + $0xa0] sm:$0xff]  ;;  %v2998_v18 = vld [vmem:[%s4017_s1 + $0x98] sm:$0xff]  ;;  %v33_v22 = vld [vmem:[%s4016_s0 + $0x10] sm:$0xff] }
   0x8   :  { %1765 = vmatpush.bf16.msra.mxu2 %v3001_v6  ;;  %v3007_v15 = vld [vmem:[%s4017_s1 + $0xe0] sm:$0xff]  ;;  %v3006_v19 = vld [vmem:[%s4017_s1 + $0xd8] sm:$0xff]  ;;  %v32_v25 = vld [vmem:[%s4016_s0 + $0x8] sm:$0xff] }
   0x9   :  { %1778 = vmatpush.bf16.msra.mxu3 %v3009_v7  ;;  %v34_v23 = vld [vmem:[%s4016_s0 + $0x18] sm:$0xff]  ;;  %v31_v24 = vld [vmem:[%s4016_s0] sm:$0xff]  ;;  %v2997_v26 = vld [vmem:[%s4017_s1 + $0x90] sm:$0xff] }
   0xa   :  { %1740 = vmatpush.bf16.msra.mxu0 %v2984_v8  ;;  %v3005_v27 = vld [vmem:[%s4017_s1 + $0xd0] sm:$0xff]  ;;  %v56_v28 = vpack.c.bf16 %v34_v23, %v33_v22  ;;  %v2980_v29 = vld [vmem:[%s4017_s1 + $0x8] sm:$0xff]  ;;  %v55_v30 = vpack.c.bf16 %v32_v25, %v31_v24 }
   0xb   :  { %1753 = vmatpush.bf16.msra.mxu1 %v2992_v9  ;;  %v2988_v31 = vld [vmem:[%s4017_s1 + $0x48] sm:$0xff] }
   0xc   :  { %1766 = vmatpush.bf16.msra.mxu2 %v3000_v10  ;;  %v2996_v33 = vld [vmem:[%s4017_s1 + $0x88] sm:$0xff] }
   0xd   :  { %1779 = vmatpush.bf16.msra.mxu3 %v3008_v11  ;;  %v3004_v34 = vld [vmem:[%s4017_s1 + $0xc8] sm:$0xff] }
   0xe   :  { %1741 = vmatpush.bf16.msra.mxu0 %v2983_v12 }
   0xf   :  { %1754 = vmatpush.bf16.msra.mxu1 %v2991_v13 }
  0x10   :  { %1767 = vmatpush.bf16.msra.mxu2 %v2999_v14 }
  0x11   :  { %1780 = vmatpush.bf16.msra.mxu3 %v3007_v15 }
  0x12   :  { %1742 = vmatpush.bf16.msra.mxu0 %v2982_v16 }
  0x13   :  { %1755 = vmatpush.bf16.msra.mxu1 %v2990_v17 }
  0x14   :  { %1768 = vmatpush.bf16.msra.mxu2 %v2998_v18 }
  0x15   :  { %1781 = vmatpush.bf16.msra.mxu3 %v3006_v19 }
  0x16   :  { %1743 = vmatpush.bf16.msra.mxu0 %v2981_v20 }
  0x17   :  { %1756 = vmatpush.bf16.msra.mxu1 %v2989_v21 }
  0x18   :  { %1769 = vmatpush.bf16.msra.mxu2 %v2997_v26 }
  0x19   :  { %1782 = vmatpush.bf16.msra.mxu3 %v3005_v27 }
  0x1a   :  { %9 = vsyncpa [#allocation4], 0  ;;  %1744 = vmatpush.bf16.msra.mxu0 %v2980_v29  ;;  %v2979_v35 = vld [vmem:[%s4017_s1] sm:$0xff]  ;;  %v516_v37 = vunpack.c.l.b16 %v56_v28  ;;  %v514_v38 = vunpack.c.l.b16 %v55_v30  ;;  %v517_v41 = vunpack.c.h.b16 %v56_v28  ;;  %v515_v42 = vunpack.c.h.b16 %v55_v30  ;;  %v3018_v43 = vld [vmem:[%s4017_s1 + $0x138] sm:$0xff]  ;;  %s2200_s20 = sshll.u32 %s4020_s4, 4  ;;  %s2201_s20 = int_to_ptr.hbm [resolvable:$true] %s2200_s20 }
  0x1b   :  { %1757 = vmatpush.bf16.msra.mxu1 %v2988_v31  ;;  %v2987_v36 = vld [vmem:[%s4017_s1 + $0x40] sm:$0xff]  ;;  %v3026_v44 = vld [vmem:[%s4017_s1 + $0x178] sm:$0xff]  ;;  %v3017_v49 = vld [vmem:[%s4017_s1 + $0x130] sm:$0xff]  ;;  %vm78_vm0 = vcmask 1043456   ;;  %vm79_vm1 = vcmask 646148   ;;  %vm2051_vm3 = vcmask 523264  }
  0x1c   :  { %1770 = vmatpush.bf16.msra.mxu2 %v2996_v33  ;;  %v2995_v39 = vld [vmem:[%s4017_s1 + $0x80] sm:$0xff]  ;;  %v3034_v45 = vld [vmem:[%s4017_s1 + $0x1b8] sm:$0xff]  ;;  %v540_v47 = vpack.c.b16 %v516_v37, %v516_v37  ;;  %v538_v48 = vpack.c.b16 %v514_v38, %v514_v38  ;;  %v541_v50 = vpack.c.b16 %v517_v41, %v517_v41  ;;  %v539_v51 = vpack.c.b16 %v515_v42, %v515_v42  ;;  %v3025_v52 = vld [vmem:[%s4017_s1 + $0x170] sm:$0xff] }
  0x1d   :  { %1783 = vmatpush.bf16.msra.mxu3 %v3004_v34  ;;  %v3003_v40 = vld [vmem:[%s4017_s1 + $0xc0] sm:$0xff]  ;;  %v3042_v46 = vld [vmem:[%s4017_s1 + $0x1f8] sm:$0xff]  ;;  %v37_v53 = vld [vmem:[%s4016_s0 + $0x30] sm:$0xff]  ;;  %vm2177_vm11 = vcmask 80896  }
  0x1e   :  { %1745 = vmatpush.bf16.msra.mxu0 %v2979_v35  ;;  %v38_v54 = vld [vmem:[%s4016_s0 + $0x38] sm:$0xff]  ;;  %v3033_v55 = vld [vmem:[%s4017_s1 + $0x1b0] sm:$0xff]  ;;  %v35_v58 = vld [vmem:[%s4016_s0 + $0x20] sm:$0xff] }
  0x1f   :  { %1758 = vmatpush.bf16.msra.mxu1 %v2987_v36  ;;  %v3041_v56 = vld [vmem:[%s4017_s1 + $0x1f0] sm:$0xff]  ;;  %v3383_v57 = vpack.c.bf16 %v38_v54, %v37_v53  ;;  %v36_v59 = vld [vmem:[%s4016_s0 + $0x28] sm:$0xff]  ;;  %v3015_v1 = vld [vmem:[%s4017_s1 + $0x120] sm:$0xff] }
  0x20   :  { %1771 = vmatpush.bf16.msra.mxu2 %v2995_v39  ;;  %v3391_v60 = vpack.c.bf16 %v36_v59, %v35_v58  ;;  %v3016_v61 = vld [vmem:[%s4017_s1 + $0x128] sm:$0xff]  ;;  %v3023_v2 = vld [vmem:[%s4017_s1 + $0x160] sm:$0xff]  ;;  %v3014_v5 = vld [vmem:[%s4017_s1 + $0x118] sm:$0xff] }
  0x21   :  { %1784 = vmatpush.bf16.msra.mxu3 %v3003_v40  ;;  %1746 = vmatmul.bf16.vlgmr.msra.gmra.mxu0 %v538_v48  ;;  %v3024_v62 = vld [vmem:[%s4017_s1 + $0x168] sm:$0xff]  ;;  %v3031_v3 = vld [vmem:[%s4017_s1 + $0x1a0] sm:$0xff]  ;;  %v3022_v6 = vld [vmem:[%s4017_s1 + $0x158] sm:$0xff]  ;;  %v520_v19 = vunpack.c.l.b16 %v3383_v57  ;;  %v521_v25 = vunpack.c.h.b16 %v3383_v57 }
  0x22   :  { %1790 = vmatpush.bf16.msrb.mxu0 %v3018_v43  ;;  %1759 = vmatmul.bf16.vlgmr.msra.gmra.mxu1 %v539_v51  ;;  %v3032_v63 = vld [vmem:[%s4017_s1 + $0x1a8] sm:$0xff]  ;;  %v3039_v4 = vld [vmem:[%s4017_s1 + $0x1e0] sm:$0xff]  ;;  %v3030_v7 = vld [vmem:[%s4017_s1 + $0x198] sm:$0xff]  ;;  %v518_v20 = vunpack.c.l.b16 %v3391_v60  ;;  %v519_v26 = vunpack.c.h.b16 %v3391_v60 }
  0x23   :  { %1803 = vmatpush.bf16.msrb.mxu1 %v3026_v44  ;;  %1772 = vmatmul.bf16.vlgmr.msra.gmra.mxu2 %v540_v47  ;;  %v3040_v0 = vld [vmem:[%s4017_s1 + $0x1e8] sm:$0xff]  ;;  %v3038_v8 = vld [vmem:[%s4017_s1 + $0x1d8] sm:$0xff]  ;;  %v3013_v9 = vld [vmem:[%s4017_s1 + $0x110] sm:$0xff]  ;;  %v544_v34 = vpack.c.b16 %v520_v19, %v520_v19  ;;  %v545_v37 = vpack.c.b16 %v521_v25, %v521_v25 }
  0x24   :  { %1816 = vmatpush.bf16.msrb.mxu2 %v3034_v45  ;;  %1785 = vmatmul.bf16.vlgmr.msra.gmra.mxu3 %v541_v50  ;;  %v3021_v10 = vld [vmem:[%s4017_s1 + $0x150] sm:$0xff]  ;;  %v3012_v13 = vld [vmem:[%s4017_s1 + $0x108] sm:$0xff]  ;;  %v3011_v17 = vld [vmem:[%s4017_s1 + $0x100] sm:$0xff]  ;;  %v542_v35 = vpack.c.b16 %v518_v20, %v518_v20  ;;  %v543_v38 = vpack.c.b16 %v519_v26, %v519_v26 }
  0x25   :  { %1829 = vmatpush.bf16.msrb.mxu3 %v3042_v46  ;;  %v3029_v11 = vld [vmem:[%s4017_s1 + $0x190] sm:$0xff]  ;;  %v3020_v14 = vld [vmem:[%s4017_s1 + $0x148] sm:$0xff]  ;;  %v3019_v18 = vld [vmem:[%s4017_s1 + $0x140] sm:$0xff] }
  0x26   :  { %1791 = vmatpush.bf16.msrb.mxu0 %v3017_v49  ;;  %v3037_v12 = vld [vmem:[%s4017_s1 + $0x1d0] sm:$0xff]  ;;  %v3028_v15 = vld [vmem:[%s4017_s1 + $0x188] sm:$0xff]  ;;  %v39_v21 = vld [vmem:[%s4016_s0 + $0x40] sm:$0xff] }
  0x27   :  { %1804 = vmatpush.bf16.msrb.mxu1 %v3025_v52  ;;  %v3036_v16 = vld [vmem:[%s4017_s1 + $0x1c8] sm:$0xff]  ;;  %v3027_v23 = vld [vmem:[%s4017_s1 + $0x180] sm:$0xff]  ;;  %v41_v28 = vld [vmem:[%s4016_s0 + $0x50] sm:$0xff] }
  0x28   :  { %1817 = vmatpush.bf16.msrb.mxu2 %v3033_v55  ;;  %v40_v22 = vld [vmem:[%s4016_s0 + $0x48] sm:$0xff]  ;;  %v3035_v24 = vld [vmem:[%s4017_s1 + $0x1c0] sm:$0xff]  ;;  %v3050_v29 = vld [vmem:[%s4017_s1 + $0x238] sm:$0xff] }
  0x29   :  { %1830 = vmatpush.bf16.msrb.mxu3 %v3041_v56  ;;  %v3475_v27 = vpack.c.bf16 %v40_v22, %v39_v21  ;;  %v3058_v30 = vld [vmem:[%s4017_s1 + $0x278] sm:$0xff]  ;;  %v3049_v39 = vld [vmem:[%s4017_s1 + $0x230] sm:$0xff]  ;;  %v3048_v43 = vld [vmem:[%s4017_s1 + $0x228] sm:$0xff] }
  0x2a   :  { %1792 = vmatpush.bf16.msrb.mxu0 %v3016_v61  ;;  %v3066_v31 = vld [vmem:[%s4017_s1 + $0x2b8] sm:$0xff]  ;;  %v3057_v40 = vld [vmem:[%s4017_s1 + $0x270] sm:$0xff]  ;;  %v3056_v44 = vld [vmem:[%s4017_s1 + $0x268] sm:$0xff] }
  0x2b   :  { %1805 = vmatpush.bf16.msrb.mxu1 %v3024_v62  ;;  %v3074_v32 = vld [vmem:[%s4017_s1 + $0x2f8] sm:$0xff]  ;;  %v3065_v41 = vld [vmem:[%s4017_s1 + $0x2b0] sm:$0xff]  ;;  %v3064_v45 = vld [vmem:[%s4017_s1 + $0x2a8] sm:$0xff] }
  0x2c   :  { %1818 = vmatpush.bf16.msrb.mxu2 %v3032_v63  ;;  %v42_v33 = vld [vmem:[%s4016_s0 + $0x58] sm:$0xff]  ;;  %v3073_v42 = vld [vmem:[%s4017_s1 + $0x2f0] sm:$0xff]  ;;  %v3072_v46 = vld [vmem:[%s4017_s1 + $0x2e8] sm:$0xff] }
  0x2d   :  { %1831 = vmatpush.bf16.msrb.mxu3 %v3040_v0  ;;  %v3495_v36 = vpack.c.bf16 %v42_v33, %v41_v28  ;;  %v3047_v47 = vld [vmem:[%s4017_s1 + $0x220] sm:$0xff]  ;;  %v3046_v51 = vld [vmem:[%s4017_s1 + $0x218] sm:$0xff]  ;;  %v3045_v55 = vld [vmem:[%s4017_s1 + $0x210] sm:$0xff] }
  0x2e   :  { %1793 = vmatpush.bf16.msrb.mxu0 %v3015_v1  ;;  %v3055_v48 = vld [vmem:[%s4017_s1 + $0x260] sm:$0xff]  ;;  %v3054_v52 = vld [vmem:[%s4017_s1 + $0x258] sm:$0xff]  ;;  %v3053_v56 = vld [vmem:[%s4017_s1 + $0x250] sm:$0xff]  ;;  %v522_v1 = vunpack.c.l.b16 %v3475_v27 }
  0x2f   :  { %1806 = vmatpush.bf16.msrb.mxu1 %v3023_v2  ;;  %v3063_v49 = vld [vmem:[%s4017_s1 + $0x2a0] sm:$0xff]  ;;  %v3062_v53 = vld [vmem:[%s4017_s1 + $0x298] sm:$0xff]  ;;  %v3061_v57 = vld [vmem:[%s4017_s1 + $0x290] sm:$0xff]  ;;  %v524_v2 = vunpack.c.l.b16 %v3495_v36 }
  0x30   :  { %1819 = vmatpush.bf16.msrb.mxu2 %v3031_v3  ;;  %v3071_v50 = vld [vmem:[%s4017_s1 + $0x2e0] sm:$0xff]  ;;  %v3070_v54 = vld [vmem:[%s4017_s1 + $0x2d8] sm:$0xff]  ;;  %v3069_v58 = vld [vmem:[%s4017_s1 + $0x2d0] sm:$0xff] }
  0x31   :  { %1832 = vmatpush.bf16.msrb.mxu3 %v3039_v4  ;;  %v3044_v59 = vld [vmem:[%s4017_s1 + $0x208] sm:$0xff]  ;;  %v3043_v63 = vld [vmem:[%s4017_s1 + $0x200] sm:$0xff]  ;;  %v3081_v21 = vld [vmem:[%s4017_s1 + $0x330] sm:$0xff] }
  0x32   :  { %1794 = vmatpush.bf16.msrb.mxu0 %v3014_v5  ;;  %v3052_v60 = vld [vmem:[%s4017_s1 + $0x248] sm:$0xff]  ;;  %v3051_v0 = vld [vmem:[%s4017_s1 + $0x240] sm:$0xff]  ;;  %v3089_v22 = vld [vmem:[%s4017_s1 + $0x370] sm:$0xff] }
  0x33   :  { %1807 = vmatpush.bf16.msrb.mxu1 %v3022_v6  ;;  %v3060_v61 = vld [vmem:[%s4017_s1 + $0x288] sm:$0xff]  ;;  %v43_v3 = vld [vmem:[%s4016_s0 + $0x60] sm:$0xff]  ;;  %v3078_v33 = vld [vmem:[%s4017_s1 + $0x318] sm:$0xff] }
  0x34   :  { %1820 = vmatpush.bf16.msrb.mxu2 %v3030_v7  ;;  %v3068_v62 = vld [vmem:[%s4017_s1 + $0x2c8] sm:$0xff]  ;;  %v3059_v5 = vld [vmem:[%s4017_s1 + $0x280] sm:$0xff]  ;;  %v523_v7 = vunpack.c.h.b16 %v3475_v27  ;;  %vm80_vm2 = vmor %vm79_vm1, %vm78_vm0 }
  0x35   :  { %1833 = vmatpush.bf16.msrb.mxu3 %v3038_v8  ;;  %v44_v4 = vld [vmem:[%s4016_s0 + $0x68] sm:$0xff]  ;;  %v3067_v6 = vld [vmem:[%s4017_s1 + $0x2c0] sm:$0xff]  ;;  %v525_v8 = vunpack.c.h.b16 %v3495_v36  ;;  %v3102_v36 = vld [vmem:[%s4017_s1 + $0x3d8] sm:$0xff] }
  0x36   :  { %1795 = vmatpush.bf16.msrb.mxu0 %v3013_v9  ;;  %v3591_v9 = vpack.c.bf16 %v44_v4, %v43_v3  ;;  %v547_v19 = vpack.c.b16 %v523_v7, %v523_v7  ;;  %v3080_v25 = vld [vmem:[%s4017_s1 + $0x328] sm:$0xff]  ;;  %v3113_v3 = vld [vmem:[%s4017_s1 + $0x430] sm:$0xff] }
  0x37   :  { %1808 = vmatpush.bf16.msrb.mxu1 %v3021_v10  ;;  %v45_v10 = vld [vmem:[%s4016_s0 + $0x70] sm:$0xff]  ;;  %v549_v20 = vpack.c.b16 %v525_v8, %v525_v8  ;;  %v3088_v26 = vld [vmem:[%s4017_s1 + $0x368] sm:$0xff] }
  0x38   :  { %1821 = vmatpush.bf16.msrb.mxu2 %v3029_v11  ;;  %v3082_v11 = vld [vmem:[%s4017_s1 + $0x338] sm:$0xff]  ;;  %v3096_v27 = vld [vmem:[%s4017_s1 + $0x3a8] sm:$0xff]  ;;  %v3121_v4 = vld [vmem:[%s4017_s1 + $0x470] sm:$0xff] }
  0x39   :  { %1834 = vmatpush.bf16.msrb.mxu3 %v3037_v12  ;;  %v3090_v12 = vld [vmem:[%s4017_s1 + $0x378] sm:$0xff]  ;;  %v3104_v28 = vld [vmem:[%s4017_s1 + $0x3e8] sm:$0xff] }
  0x3a   :  { %1796 = vmatpush.bf16.msrb.mxu0 %v3012_v13  ;;  %v3098_v13 = vld [vmem:[%s4017_s1 + $0x3b8] sm:$0xff]  ;;  %v3112_v7 = vld [vmem:[%s4017_s1 + $0x428] sm:$0xff] }
  0x3b   :  { %1809 = vmatpush.bf16.msrb.mxu1 %v3020_v14  ;;  %v3106_v14 = vld [vmem:[%s4017_s1 + $0x3f8] sm:$0xff]  ;;  %v3120_v8 = vld [vmem:[%s4017_s1 + $0x468] sm:$0xff] }
  0x3c   :  { %1822 = vmatpush.bf16.msrb.mxu2 %v3028_v15  ;;  %v46_v15 = vld [vmem:[%s4016_s0 + $0x78] sm:$0xff] }
  0x3d   :  { %1835 = vmatpush.bf16.msrb.mxu3 %v3036_v16  ;;  %v546_v16 = vpack.c.b16 %v522_v1, %v522_v1 }
  0x3e   :  { %1797 = vmatpush.bf16.msrb.mxu0 %v3011_v17  ;;  %v548_v17 = vpack.c.b16 %v524_v2, %v524_v2 }
  0x3f   :  { %1810 = vmatpush.bf16.msrb.mxu1 %v3019_v18  ;;  %v3611_v18 = vpack.c.bf16 %v46_v15, %v45_v10  ;;  %v3136_v10 = vld [vmem:[%s4017_s1 + $0x4e8] sm:$0xff]  ;;  %v3110_v15 = vld [vmem:[%s4017_s1 + $0x418] sm:$0xff] }
  0x40   :  { %1823 = vmatpush.bf16.msrb.mxu2 %v3027_v23  ;;  %v3097_v23 = vld [vmem:[%s4017_s1 + $0x3b0] sm:$0xff] }
  0x41   :  { %1836 = vmatpush.bf16.msrb.mxu3 %v3035_v24  ;;  %1798 = vmatmul.bf16.vlgmr.msrb.gmra.mxu0 %v542_v35  ;;  %v3105_v24 = vld [vmem:[%s4017_s1 + $0x3f0] sm:$0xff]  ;;  %v3094_v35 = vld [vmem:[%s4017_s1 + $0x398] sm:$0xff] }
  0x42   :  { %1842 = vmatpush.bf16.msra.mxu0 %v3050_v29  ;;  %1811 = vmatmul.bf16.vlgmr.msrb.gmra.mxu1 %v543_v38  ;;  %v3079_v29 = vld [vmem:[%s4017_s1 + $0x320] sm:$0xff]  ;;  %v3085_v38 = vld [vmem:[%s4017_s1 + $0x350] sm:$0xff] }
  0x43   :  { %1855 = vmatpush.bf16.msra.mxu1 %v3058_v30  ;;  %1824 = vmatmul.bf16.vlgmr.msrb.gmra.mxu2 %v544_v34  ;;  %v3087_v30 = vld [vmem:[%s4017_s1 + $0x360] sm:$0xff]  ;;  %v3086_v34 = vld [vmem:[%s4017_s1 + $0x358] sm:$0xff] }
  0x44   :  { %1868 = vmatpush.bf16.msra.mxu2 %v3066_v31  ;;  %1837 = vmatmul.bf16.vlgmr.msrb.gmra.mxu3 %v545_v37  ;;  %v3095_v31 = vld [vmem:[%s4017_s1 + $0x3a0] sm:$0xff]  ;;  %v3077_v37 = vld [vmem:[%s4017_s1 + $0x310] sm:$0xff] }
  0x45   :  { %1881 = vmatpush.bf16.msra.mxu3 %v3074_v32  ;;  %v3103_v32 = vld [vmem:[%s4017_s1 + $0x3e0] sm:$0xff] }
  0x46   :  { %1843 = vmatpush.bf16.msra.mxu0 %v3049_v39  ;;  %v3093_v39 = vld [vmem:[%s4017_s1 + $0x390] sm:$0xff] }
  0x47   :  { %1856 = vmatpush.bf16.msra.mxu1 %v3057_v40  ;;  %v3101_v40 = vld [vmem:[%s4017_s1 + $0x3d0] sm:$0xff] }
  0x48   :  { %1869 = vmatpush.bf16.msra.mxu2 %v3065_v41  ;;  %v3076_v41 = vld [vmem:[%s4017_s1 + $0x308] sm:$0xff] }
  0x49   :  { %1882 = vmatpush.bf16.msra.mxu3 %v3073_v42  ;;  %v3084_v42 = vld [vmem:[%s4017_s1 + $0x348] sm:$0xff] }
  0x4a   :  { %1844 = vmatpush.bf16.msra.mxu0 %v3048_v43  ;;  %v3092_v43 = vld [vmem:[%s4017_s1 + $0x388] sm:$0xff] }
  0x4b   :  { %1857 = vmatpush.bf16.msra.mxu1 %v3056_v44  ;;  %v3100_v44 = vld [vmem:[%s4017_s1 + $0x3c8] sm:$0xff] }
  0x4c   :  { %1870 = vmatpush.bf16.msra.mxu2 %v3064_v45  ;;  %v3075_v45 = vld [vmem:[%s4017_s1 + $0x300] sm:$0xff] }
  0x4d   :  { %1883 = vmatpush.bf16.msra.mxu3 %v3072_v46  ;;  %v3083_v46 = vld [vmem:[%s4017_s1 + $0x340] sm:$0xff] }
  0x4e   :  { %1845 = vmatpush.bf16.msra.mxu0 %v3047_v47  ;;  %v526_v47 = vunpack.c.l.b16 %v3591_v9 }
  0x4f   :  { %1858 = vmatpush.bf16.msra.mxu1 %v3055_v48  ;;  %v528_v48 = vunpack.c.l.b16 %v3611_v18 }
  0x50   :  { %1871 = vmatpush.bf16.msra.mxu2 %v3063_v49  ;;  %v47_v49 = vld [vmem:[%s4016_s0 + $0x80] sm:$0xff] }
  0x51   :  { %1884 = vmatpush.bf16.msra.mxu3 %v3071_v50  ;;  %v48_v50 = vld [vmem:[%s4016_s0 + $0x88] sm:$0xff] }
  0x52   :  { %1846 = vmatpush.bf16.msra.mxu0 %v3046_v51  ;;  %v3091_v51 = vld [vmem:[%s4017_s1 + $0x380] sm:$0xff] }
  0x53   :  { %1859 = vmatpush.bf16.msra.mxu1 %v3054_v52  ;;  %v3099_v52 = vld [vmem:[%s4017_s1 + $0x3c0] sm:$0xff] }
  0x54   :  { %1872 = vmatpush.bf16.msra.mxu2 %v3062_v53  ;;  %v527_v53 = vunpack.c.h.b16 %v3591_v9  ;;  %v3128_v9 = vld [vmem:[%s4017_s1 + $0x4a8] sm:$0xff] }
  0x55   :  { %1885 = vmatpush.bf16.msra.mxu3 %v3070_v54  ;;  %v529_v54 = vunpack.c.h.b16 %v3611_v18  ;;  %v3134_v18 = vld [vmem:[%s4017_s1 + $0x4d8] sm:$0xff] }
  0x56   :  { %1847 = vmatpush.bf16.msra.mxu0 %v3045_v55  ;;  %v3707_v55 = vpack.c.bf16 %v48_v50, %v47_v49  ;;  %v551_v1 = vpack.c.b16 %v527_v53, %v527_v53  ;;  %v3145_v49 = vld [vmem:[%s4017_s1 + $0x530] sm:$0xff]  ;;  %v3144_v53 = vld [vmem:[%s4017_s1 + $0x528] sm:$0xff] }
  0x57   :  { %1860 = vmatpush.bf16.msra.mxu1 %v3053_v56  ;;  %v49_v56 = vld [vmem:[%s4016_s0 + $0x90] sm:$0xff]  ;;  %v553_v2 = vpack.c.b16 %v529_v54, %v529_v54  ;;  %v3152_v54 = vld [vmem:[%s4017_s1 + $0x568] sm:$0xff] }
  0x58   :  { %1873 = vmatpush.bf16.msra.mxu2 %v3061_v57  ;;  %v3114_v57 = vld [vmem:[%s4017_s1 + $0x438] sm:$0xff]  ;;  %v3153_v50 = vld [vmem:[%s4017_s1 + $0x570] sm:$0xff] }
  0x59   :  { %1886 = vmatpush.bf16.msra.mxu3 %v3069_v58  ;;  %v3122_v58 = vld [vmem:[%s4017_s1 + $0x478] sm:$0xff] }
  0x5a   :  { %1848 = vmatpush.bf16.msra.mxu0 %v3044_v59  ;;  %v3130_v59 = vld [vmem:[%s4017_s1 + $0x4b8] sm:$0xff] }
  0x5b   :  { %1861 = vmatpush.bf16.msra.mxu1 %v3052_v60  ;;  %v3138_v60 = vld [vmem:[%s4017_s1 + $0x4f8] sm:$0xff] }
  0x5c   :  { %1874 = vmatpush.bf16.msra.mxu2 %v3060_v61  ;;  %v50_v61 = vld [vmem:[%s4016_s0 + $0x98] sm:$0xff] }
  0x5d   :  { %1887 = vmatpush.bf16.msra.mxu3 %v3068_v62  ;;  %v550_v62 = vpack.c.b16 %v526_v47, %v526_v47 }
  0x5e   :  { %1849 = vmatpush.bf16.msra.mxu0 %v3043_v63  ;;  %v552_v63 = vpack.c.b16 %v528_v48, %v528_v48 }
  0x5f   :  { %1862 = vmatpush.bf16.msra.mxu1 %v3051_v0  ;;  %v3727_v0 = vpack.c.bf16 %v50_v61, %v49_v56  ;;  %v3160_v56 = vld [vmem:[%s4017_s1 + $0x5a8] sm:$0xff] }
  0x60   :  { %1875 = vmatpush.bf16.msra.mxu2 %v3059_v5  ;;  %v3129_v5 = vld [vmem:[%s4017_s1 + $0x4b0] sm:$0xff] }
  0x61   :  { %1888 = vmatpush.bf16.msra.mxu3 %v3067_v6  ;;  %1850 = vmatmul.bf16.vlgmr.msra.gmra.mxu0 %v546_v16  ;;  %v3137_v6 = vld [vmem:[%s4017_s1 + $0x4f0] sm:$0xff]  ;;  %v3118_v16 = vld [vmem:[%s4017_s1 + $0x458] sm:$0xff] }
  0x62   :  { %1894 = vmatpush.bf16.msrb.mxu0 %v3082_v11  ;;  %1863 = vmatmul.bf16.vlgmr.msra.gmra.mxu1 %v547_v19  ;;  %v3111_v11 = vld [vmem:[%s4017_s1 + $0x420] sm:$0xff]  ;;  %v53_v19 = vld [vmem:[%s4016_s0 + $0xb0] sm:$0xff] }
  0x63   :  { %1907 = vmatpush.bf16.msrb.mxu1 %v3090_v12  ;;  %1876 = vmatmul.bf16.vlgmr.msra.gmra.mxu2 %v548_v17  ;;  %v3119_v12 = vld [vmem:[%s4017_s1 + $0x460] sm:$0xff]  ;;  %v3126_v17 = vld [vmem:[%s4017_s1 + $0x498] sm:$0xff] }
  0x64   :  { %1920 = vmatpush.bf16.msrb.mxu2 %v3098_v13  ;;  %1889 = vmatmul.bf16.vlgmr.msra.gmra.mxu3 %v549_v20  ;;  %v3127_v13 = vld [vmem:[%s4017_s1 + $0x4a0] sm:$0xff]  ;;  %v54_v20 = vld [vmem:[%s4016_s0 + $0xb8] sm:$0xff] }
  0x65   :  { %1933 = vmatpush.bf16.msrb.mxu3 %v3106_v14  ;;  %v3135_v14 = vld [vmem:[%s4017_s1 + $0x4e0] sm:$0xff] }
  0x66   :  { %1895 = vmatpush.bf16.msrb.mxu0 %v3081_v21  ;;  %v3109_v21 = vld [vmem:[%s4017_s1 + $0x410] sm:$0xff] }
  0x67   :  { %1908 = vmatpush.bf16.msrb.mxu1 %v3089_v22  ;;  %v3117_v22 = vld [vmem:[%s4017_s1 + $0x450] sm:$0xff] }
  0x68   :  { %1921 = vmatpush.bf16.msrb.mxu2 %v3097_v23  ;;  %v66_v23 = vpack.c.bf16 %v54_v20, %v53_v19  ;;  %v3164_v19 = vld [vmem:[%s4017_s1 + $0x5c8] sm:$0xff] }
  0x69   :  { %1934 = vmatpush.bf16.msrb.mxu3 %v3105_v24  ;;  %v3125_v24 = vld [vmem:[%s4017_s1 + $0x490] sm:$0xff] }
  0x6a   :  { %1896 = vmatpush.bf16.msrb.mxu0 %v3080_v25  ;;  %v3133_v25 = vld [vmem:[%s4017_s1 + $0x4d0] sm:$0xff]  ;;  %81 = vst.msk [vmem:[#allocation2 + $0x58] sm:$0xff] %vm80_vm2, %v66_v23 }
  0x6b   :  { %1909 = vmatpush.bf16.msrb.mxu1 %v3088_v26  ;;  %v3108_v26 = vld [vmem:[%s4017_s1 + $0x408] sm:$0xff] }
  0x6c   :  { %1922 = vmatpush.bf16.msrb.mxu2 %v3096_v27  ;;  %v3116_v27 = vld [vmem:[%s4017_s1 + $0x448] sm:$0xff] }
  0x6d   :  { %1935 = vmatpush.bf16.msrb.mxu3 %v3104_v28  ;;  %v3124_v28 = vld [vmem:[%s4017_s1 + $0x488] sm:$0xff] }
  0x6e   :  { %1897 = vmatpush.bf16.msrb.mxu0 %v3079_v29  ;;  %v3132_v29 = vld [vmem:[%s4017_s1 + $0x4c8] sm:$0xff] }
  0x6f   :  { %1910 = vmatpush.bf16.msrb.mxu1 %v3087_v30  ;;  %v51_v30 = vld [vmem:[%s4016_s0 + $0xa0] sm:$0xff] }
  0x70   :  { %1923 = vmatpush.bf16.msrb.mxu2 %v3095_v31  ;;  %v52_v31 = vld [vmem:[%s4016_s0 + $0xa8] sm:$0xff] }
  0x71   :  { %1936 = vmatpush.bf16.msrb.mxu3 %v3103_v32  ;;  %v3107_v32 = vld [vmem:[%s4017_s1 + $0x400] sm:$0xff]  ;;  %v93_v20 = vld [vmem:[#allocation2 + $0x58] sm:$0xff] }
  0x72   :  { %1898 = vmatpush.bf16.msrb.mxu0 %v3078_v33  ;;  %v3115_v33 = vld [vmem:[%s4017_s1 + $0x440] sm:$0xff] }
  0x73   :  { %1911 = vmatpush.bf16.msrb.mxu1 %v3086_v34  ;;  %v530_v34 = vunpack.c.l.b16 %v3707_v55 }
  0x74   :  { %1924 = vmatpush.bf16.msrb.mxu2 %v3094_v35  ;;  %v532_v35 = vunpack.c.l.b16 %v3727_v0 }
  0x75   :  { %1937 = vmatpush.bf16.msrb.mxu3 %v3102_v36  ;;  %v3821_v36 = vpack.c.bf16 %v52_v31, %v51_v30  ;;  %v3163_v30 = vld [vmem:[%s4017_s1 + $0x5c0] sm:$0xff] }
  0x76   :  { %1899 = vmatpush.bf16.msrb.mxu0 %v3077_v37  ;;  %v3123_v37 = vld [vmem:[%s4017_s1 + $0x480] sm:$0xff] }
  0x77   :  { %1912 = vmatpush.bf16.msrb.mxu1 %v3085_v38  ;;  %v3131_v38 = vld [vmem:[%s4017_s1 + $0x4c0] sm:$0xff]  ;;  %v534_v23 = vunpack.c.l.b16 %v3821_v36 }
  0x78   :  { %1925 = vmatpush.bf16.msrb.mxu2 %v3093_v39  ;;  %v531_v39 = vunpack.c.h.b16 %v3707_v55  ;;  %v3174_v55 = vld [vmem:[%s4018_s2] ss:$0 sm:$0xff] }
  0x79   :  { %1938 = vmatpush.bf16.msrb.mxu3 %v3101_v40  ;;  %v533_v40 = vunpack.c.h.b16 %v3727_v0  ;;  %v3167_v0 = vld [vmem:[%s4017_s1 + $0x5e0] sm:$0xff]  ;;  %v558_v31 = vpack.c.b16 %v534_v23, %v534_v23 }
  0x7a   :  { %1900 = vmatpush.bf16.msrb.mxu0 %v3076_v41  ;;  %v3146_v41 = vld [vmem:[%s4017_s1 + $0x538] sm:$0xff]  ;;  %v555_v47 = vpack.c.b16 %v531_v39, %v531_v39 }
  0x7b   :  { %1913 = vmatpush.bf16.msrb.mxu1 %v3084_v42  ;;  %v3154_v42 = vld [vmem:[%s4017_s1 + $0x578] sm:$0xff]  ;;  %v557_v48 = vpack.c.b16 %v533_v40, %v533_v40 }
  0x7c   :  { %1926 = vmatpush.bf16.msrb.mxu2 %v3092_v43  ;;  %v3162_v43 = vld [vmem:[%s4017_s1 + $0x5b8] sm:$0xff] }
  0x7d   :  { %1939 = vmatpush.bf16.msrb.mxu3 %v3100_v44  ;;  %v3170_v44 = vld [vmem:[%s4017_s1 + $0x5f8] sm:$0xff] }
  0x7e   :  { %1901 = vmatpush.bf16.msrb.mxu0 %v3075_v45  ;;  %v554_v45 = vpack.c.b16 %v530_v34, %v530_v34 }
  0x7f   :  { %1914 = vmatpush.bf16.msrb.mxu1 %v3083_v46  ;;  %v556_v46 = vpack.c.b16 %v532_v35, %v532_v35 }
  0x80   :  { %1927 = vmatpush.bf16.msrb.mxu2 %v3091_v51  ;;  %v3161_v51 = vld [vmem:[%s4017_s1 + $0x5b0] sm:$0xff] }
  0x81   :  { %1940 = vmatpush.bf16.msrb.mxu3 %v3099_v52  ;;  %1902 = vmatmul.bf16.vlgmr.msrb.gmra.mxu0 %v550_v62  ;;  %v3169_v52 = vld [vmem:[%s4017_s1 + $0x5f0] sm:$0xff] }
  0x82   :  { %1946 = vmatpush.bf16.msra.mxu0 %v3114_v57  ;;  %1915 = vmatmul.bf16.vlgmr.msrb.gmra.mxu1 %v551_v1  ;;  %v3168_v57 = vld [vmem:[%s4017_s1 + $0x5e8] sm:$0xff] }
  0x83   :  { %1959 = vmatpush.bf16.msra.mxu1 %v3122_v58  ;;  %1928 = vmatmul.bf16.vlgmr.msrb.gmra.mxu2 %v552_v63  ;;  %v3159_v63 = vld [vmem:[%s4017_s1 + $0x5a0] sm:$0xff] }
  0x84   :  { %1972 = vmatpush.bf16.msra.mxu2 %v3130_v59  ;;  %1941 = vmatmul.bf16.vlgmr.msrb.gmra.mxu3 %v553_v2  ;;  %v3143_v59 = vld [vmem:[%s4017_s1 + $0x520] sm:$0xff]  ;;  %v3142_v2 = vld [vmem:[%s4017_s1 + $0x518] sm:$0xff] }
  0x85   :  { %1985 = vmatpush.bf16.msra.mxu3 %v3138_v60  ;;  %v3151_v60 = vld [vmem:[%s4017_s1 + $0x560] sm:$0xff] }
  0x86   :  { %1947 = vmatpush.bf16.msra.mxu0 %v3113_v3  ;;  %v3150_v3 = vld [vmem:[%s4017_s1 + $0x558] sm:$0xff] }
  0x87   :  { %1960 = vmatpush.bf16.msra.mxu1 %v3121_v4  ;;  %v3158_v4 = vld [vmem:[%s4017_s1 + $0x598] sm:$0xff] }
  0x88   :  { %1973 = vmatpush.bf16.msra.mxu2 %v3129_v5  ;;  %v3166_v5 = vld [vmem:[%s4017_s1 + $0x5d8] sm:$0xff] }
  0x89   :  { %1986 = vmatpush.bf16.msra.mxu3 %v3137_v6 }
  0x8a   :  { %1948 = vmatpush.bf16.msra.mxu0 %v3112_v7 }
  0x8b   :  { %1961 = vmatpush.bf16.msra.mxu1 %v3120_v8 }
  0x8c   :  { %1974 = vmatpush.bf16.msra.mxu2 %v3128_v9 }
  0x8d   :  { %1987 = vmatpush.bf16.msra.mxu3 %v3136_v10  ;;  %v3141_v10 = vld [vmem:[%s4017_s1 + $0x510] sm:$0xff] }
  0x8e   :  { %1949 = vmatpush.bf16.msra.mxu0 %v3111_v11  ;;  %v3149_v11 = vld [vmem:[%s4017_s1 + $0x550] sm:$0xff] }
  0x8f   :  { %1962 = vmatpush.bf16.msra.mxu1 %v3119_v12 }
  0x90   :  { %1975 = vmatpush.bf16.msra.mxu2 %v3127_v13 }
  0x91   :  { %1988 = vmatpush.bf16.msra.mxu3 %v3135_v14  ;;  %v3157_v14 = vld [vmem:[%s4017_s1 + $0x590] sm:$0xff] }
  0x92   :  { %1950 = vmatpush.bf16.msra.mxu0 %v3110_v15  ;;  %v3165_v15 = vld [vmem:[%s4017_s1 + $0x5d0] sm:$0xff] }
  0x93   :  { %1963 = vmatpush.bf16.msra.mxu1 %v3118_v16  ;;  %v3140_v16 = vld [vmem:[%s4017_s1 + $0x508] sm:$0xff] }
  0x94   :  { %1976 = vmatpush.bf16.msra.mxu2 %v3126_v17  ;;  %v3148_v17 = vld [vmem:[%s4017_s1 + $0x548] sm:$0xff] }
  0x95   :  { %1989 = vmatpush.bf16.msra.mxu3 %v3134_v18  ;;  %v3156_v18 = vld [vmem:[%s4017_s1 + $0x588] sm:$0xff] }
  0x96   :  { %1951 = vmatpush.bf16.msra.mxu0 %v3109_v21 }
  0x97   :  { %1964 = vmatpush.bf16.msra.mxu1 %v3117_v22 }
  0x98   :  { %1977 = vmatpush.bf16.msra.mxu2 %v3125_v24  ;;  %v535_v24 = vunpack.c.h.b16 %v3821_v36 }
  0x99   :  { %1990 = vmatpush.bf16.msra.mxu3 %v3133_v25  ;;  %v3139_v25 = vld [vmem:[%s4017_s1 + $0x500] sm:$0xff] }
  0x9a   :  { %1952 = vmatpush.bf16.msra.mxu0 %v3108_v26  ;;  %v3147_v26 = vld [vmem:[%s4017_s1 + $0x540] sm:$0xff] }
  0x9b   :  { %1965 = vmatpush.bf16.msra.mxu1 %v3116_v27  ;;  %v536_v27 = vunpack.c.l.b16 %v93_v20 }
  0x9c   :  { %1978 = vmatpush.bf16.msra.mxu2 %v3124_v28  ;;  %v537_v28 = vunpack.c.h.b16 %v93_v20 }
  0x9d   :  { %1991 = vmatpush.bf16.msra.mxu3 %v3132_v29  ;;  %v3155_v29 = vld [vmem:[%s4017_s1 + $0x580] sm:$0xff] }
  0x9e   :  { %1953 = vmatpush.bf16.msra.mxu0 %v3107_v32  ;;  %v1747_v58 = vpop.f32.mrf.mxu0  ;;  %v559_v32 = vpack.c.b16 %v535_v24, %v535_v24  ;;  %v561_v34 = vpack.c.b16 %v537_v28, %v537_v28 }
  0x9f   :  { %1966 = vmatpush.bf16.msra.mxu1 %v3115_v33  ;;  %v1748_v61 = vadd.f32 %v3174_v55, %v1747_v58  ;;  %v1760_v62 = vpop.f32.mrf.mxu1  ;;  %v560_v33 = vpack.c.b16 %v536_v27, %v536_v27 }
  0xa0   :  { %1979 = vmatpush.bf16.msra.mxu2 %v3123_v37 }
  0xa1   :  { %1992 = vmatpush.bf16.msra.mxu3 %v3131_v38  ;;  %1954 = vmatmul.bf16.vlgmr.msra.gmra.mxu0 %v554_v45  ;;  %v1761_v1 = vadd.f32 %v1760_v62, %v1748_v61 }
  0xa2   :  { %1998 = vmatpush.bf16.msrb.mxu0 %v3146_v41  ;;  %1967 = vmatmul.bf16.vlgmr.msra.gmra.mxu1 %v555_v47 }
  0xa3   :  { %2011 = vmatpush.bf16.msrb.mxu1 %v3154_v42  ;;  %1980 = vmatmul.bf16.vlgmr.msra.gmra.mxu2 %v556_v46 }
  0xa4   :  { %2024 = vmatpush.bf16.msrb.mxu2 %v3162_v43  ;;  %1993 = vmatmul.bf16.vlgmr.msra.gmra.mxu3 %v557_v48 }
  0xa5   :  { %2037 = vmatpush.bf16.msrb.mxu3 %v3170_v44 }
  0xa6   :  { %1999 = vmatpush.bf16.msrb.mxu0 %v3145_v49  ;;  %v1773_v6 = vpop.f32.mrf.mxu2  ;;  %v1749_v9 = vpop.f32.mrf.mxu0 }
  0xa7   :  { %2012 = vmatpush.bf16.msrb.mxu1 %v3153_v50  ;;  %v1774_v7 = vadd.f32 %v1773_v6, %v1761_v1  ;;  %v1786_v8 = vpop.f32.mrf.mxu3  ;;  %v1762_v13 = vpop.f32.mrf.mxu1 }
  0xa8   :  { %2025 = vmatpush.bf16.msrb.mxu2 %v3161_v51 }
  0xa9   :  { %2038 = vmatpush.bf16.msrb.mxu3 %v3169_v52  ;;  %v1787_v12 = vadd.f32 %v1786_v8, %v1774_v7 }
  0xaa   :  { %2000 = vmatpush.bf16.msrb.mxu0 %v3144_v53 }
  0xab   :  { %2013 = vmatpush.bf16.msrb.mxu1 %v3152_v54 }
  0xac   :  { %2026 = vmatpush.bf16.msrb.mxu2 %v3160_v56 }
  0xad   :  { %2039 = vmatpush.bf16.msrb.mxu3 %v3168_v57 }
  0xae   :  { %2001 = vmatpush.bf16.msrb.mxu0 %v3143_v59  ;;  %v1775_v21 = vpop.f32.mrf.mxu2 }
  0xaf   :  { %2014 = vmatpush.bf16.msrb.mxu1 %v3151_v60  ;;  %v1788_v22 = vpop.f32.mrf.mxu3 }
  0xb0   :  { %2027 = vmatpush.bf16.msrb.mxu2 %v3159_v63 }
  0xb1   :  { %2040 = vmatpush.bf16.msrb.mxu3 %v3167_v0 }
  0xb2   :  { %2002 = vmatpush.bf16.msrb.mxu0 %v3142_v2 }
  0xb3   :  { %2015 = vmatpush.bf16.msrb.mxu1 %v3150_v3 }
  0xb4   :  { %2028 = vmatpush.bf16.msrb.mxu2 %v3158_v4 }
  0xb5   :  { %2041 = vmatpush.bf16.msrb.mxu3 %v3166_v5 }
  0xb6   :  { %2003 = vmatpush.bf16.msrb.mxu0 %v3141_v10 }
  0xb7   :  { %2016 = vmatpush.bf16.msrb.mxu1 %v3149_v11 }
  0xb8   :  { %2029 = vmatpush.bf16.msrb.mxu2 %v3157_v14 }
  0xb9   :  { %2042 = vmatpush.bf16.msrb.mxu3 %v3165_v15 }
  0xba   :  { %2004 = vmatpush.bf16.msrb.mxu0 %v3140_v16 }
  0xbb   :  { %2017 = vmatpush.bf16.msrb.mxu1 %v3148_v17 }
  0xbc   :  { %2030 = vmatpush.bf16.msrb.mxu2 %v3156_v18  ;;  %v3218_v18 = vmov 8.0  }
  0xbd   :  { %2043 = vmatpush.bf16.msrb.mxu3 %v3164_v19  ;;  %3181 = vrcp.f32 %v3218_v18 }
  0xbe   :  { %2005 = vmatpush.bf16.msrb.mxu0 %v3139_v25  ;;  %v1799_v35 = vpop.f32.mrf.mxu0 }
  0xbf   :  { %2018 = vmatpush.bf16.msrb.mxu1 %v3147_v26  ;;  %v1800_v36 = vadd.f32 %v1799_v35, %v1787_v12  ;;  %v1812_v37 = vpop.f32.mrf.mxu1 }
  0xc0   :  { %2031 = vmatpush.bf16.msrb.mxu2 %v3155_v29 }
  0xc1   :  { %2044 = vmatpush.bf16.msrb.mxu3 %v3163_v30  ;;  %2006 = vmatmul.bf16.vlgmr.msrb.gmra.mxu0 %v558_v31  ;;  %v1813_v38 = vadd.f32 %v1812_v37, %v1800_v36 }
  0xc2   :  { %2019 = vmatmul.bf16.vlgmr.msrb.gmra.mxu1 %v559_v32 }
  0xc3   :  { %2032 = vmatmul.bf16.vlgmr.msrb.gmra.mxu2 %v560_v33  ;;  %v3182_v23 = vpop.eup %3181 }
  0xc4   :  { %2045 = vmatmul.bf16.vlgmr.msrb.gmra.mxu3 %v561_v34  ;;  %v2060_v28 = vmul.f32 8.0, %v3182_v23  ;;  %vm2064_vm4 = vweird.f32 %v3182_v23 }
  0xc6   :  { %v1825_v39 = vpop.f32.mrf.mxu2  ;;  %v1801_v42 = vpop.f32.mrf.mxu0  ;;  %v2061_v33 = vsub.f32 1.0, %v2060_v28 }
  0xc7   :  { %v1826_v40 = vadd.f32 %v1825_v39, %v1813_v38  ;;  %v1838_v41 = vpop.f32.mrf.mxu3  ;;  %v1814_v44 = vpop.f32.mrf.mxu1 }
  0xc8   :  { %v2062_v38 = vmul.f32 %v3182_v23, %v2061_v33 }
  0xc9   :  { %v1839_v43 = vadd.f32 %v1838_v41, %v1826_v40 }
  0xca   :  { %v2063_v41 = vadd.f32 %v3182_v23, %v2062_v38  ;;  %v494_v38 = vld [vmem:[%s4019_s3 + $0x48] sm:$0xff] }
  0xcc   :  { %v3933_v44 = vsel %vm2064_vm4, %v3182_v23, %v2063_v41 }
  0xce   :  { %v1827_v45 = vpop.f32.mrf.mxu2 }
  0xcf   :  { %v1840_v46 = vpop.f32.mrf.mxu3 }
  0xd0   :  { %v492_v46 = vld [vmem:[%s4019_s3 + $0x38] sm:$0xff] }
  0xd1   :  { %2105 = vmatpush.msra.mxu0 %v492_v46 }
  0xde   :  { %v1851_v47 = vpop.f32.mrf.mxu0 }
  0xdf   :  { %v1852_v48 = vadd.f32 %v1851_v47, %v1839_v43  ;;  %v1864_v49 = vpop.f32.mrf.mxu1 }
  0xe1   :  { %v1865_v50 = vadd.f32 %v1864_v49, %v1852_v48  ;;  %v491_v48 = vld [vmem:[%s4019_s3 + $0x30] sm:$0xff] }
  0xe2   :  { %2106 = vmatpush.msra.mxu0 %v491_v48 }
  0xe6   :  { %v1877_v51 = vpop.f32.mrf.mxu2  ;;  %v1853_v54 = vpop.f32.mrf.mxu0 }
  0xe7   :  { %v1878_v52 = vadd.f32 %v1877_v51, %v1865_v50  ;;  %v1890_v53 = vpop.f32.mrf.mxu3  ;;  %v1866_v56 = vpop.f32.mrf.mxu1  ;;  %v490_v50 = vld [vmem:[%s4019_s3 + $0x28] sm:$0xff] }
  0xe8   :  { %2107 = vmatpush.msra.mxu0 %v490_v50 }
  0xe9   :  { %v1891_v55 = vadd.f32 %v1890_v53, %v1878_v52  ;;  %v489_v52 = vld [vmem:[%s4019_s3 + $0x20] sm:$0xff] }
  0xea   :  { %2108 = vmatpush.msra.mxu0 %v489_v52  ;;  %v3178_v52 = vld [vmem:[%s4018_s2 + $0x4] ss:$0 sm:$0xff] }
  0xee   :  { %v1879_v57 = vpop.f32.mrf.mxu2 }
  0xef   :  { %v1892_v58 = vpop.f32.mrf.mxu3  ;;  %v487_v57 = vld [vmem:[%s4019_s3 + $0x10] sm:$0xff] }
  0xfe   :  { %v1903_v59 = vpop.f32.mrf.mxu0 }
  0xff   :  { %v1916_v60 = vpop.f32.mrf.mxu1  ;;  %v1904_v6 = vadd.f32 %v1903_v59, %v1891_v55  ;;  %v488_v55 = vld [vmem:[%s4019_s3 + $0x18] sm:$0xff]  ;;  %v486_v59 = vld [vmem:[%s4019_s3 + $0x8] sm:$0xff] }
 0x100   :  { %2109 = vmatpush.msra.mxu0 %v488_v55 }
 0x101   :  { %v1917_v10 = vadd.f32 %v1916_v60, %v1904_v6 }
 0x102   :  { %2110 = vmatpush.msra.mxu0 %v487_v57  ;;  %v3180_v57 = vld [vmem:[%s4018_s2 + $0x6] ss:$0 sm:$0xff] }
 0x104   :  { %2111 = vmatpush.msra.mxu0 %v486_v59 }
 0x106   :  { %v1929_v61 = vpop.f32.mrf.mxu2  ;;  %v1905_v63 = vpop.f32.mrf.mxu0 }
 0x107   :  { %v1942_v62 = vpop.f32.mrf.mxu3  ;;  %v1918_v0 = vpop.f32.mrf.mxu1  ;;  %v1930_v11 = vadd.f32 %v1929_v61, %v1917_v10  ;;  %v485_v61 = vld [vmem:[%s4019_s3] sm:$0xff] }
 0x108   :  { %2112 = vmatpush.msra.mxu0 %v485_v61 }
 0x109   :  { %v1943_v14 = vadd.f32 %v1942_v62, %v1930_v11  ;;  %v3176_v11 = vld [vmem:[%s4018_s2 + $0x2] ss:$0 sm:$0xff] }
 0x10e   :  { %v1931_v1 = vpop.f32.mrf.mxu2 }
 0x10f   :  { %v1944_v2 = vpop.f32.mrf.mxu3 }
 0x11e   :  { %v1955_v3 = vpop.f32.mrf.mxu0 }
 0x11f   :  { %v1968_v4 = vpop.f32.mrf.mxu1  ;;  %v1956_v15 = vadd.f32 %v1955_v3, %v1943_v14  ;;  %v3177_v14 = vld [vmem:[%s4018_s2 + $0x3] ss:$0 sm:$0xff] }
 0x121   :  { %v1969_v16 = vadd.f32 %v1968_v4, %v1956_v15 }
 0x126   :  { %v1981_v5 = vpop.f32.mrf.mxu2  ;;  %v1957_v8 = vpop.f32.mrf.mxu0 }
 0x127   :  { %v1994_v7 = vpop.f32.mrf.mxu3  ;;  %v1970_v9 = vpop.f32.mrf.mxu1  ;;  %v1982_v17 = vadd.f32 %v1981_v5, %v1969_v16  ;;  %v3175_v8 = vld [vmem:[%s4018_s2 + $0x1] ss:$0 sm:$0xff] }
 0x129   :  { %v1995_v19 = vadd.f32 %v1994_v7, %v1982_v17 }
 0x12e   :  { %v1983_v12 = vpop.f32.mrf.mxu2 }
 0x12f   :  { %v1996_v13 = vpop.f32.mrf.mxu3 }
 0x13e   :  { %v2007_v20 = vpop.f32.mrf.mxu0 }
 0x13f   :  { %v2020_v21 = vpop.f32.mrf.mxu1  ;;  %v2008_v22 = vadd.f32 %v2007_v20, %v1995_v19 }
 0x141   :  { %v2021_v24 = vadd.f32 %v2020_v21, %v2008_v22 }
 0x146   :  { %v2033_v25 = vpop.f32.mrf.mxu2  ;;  %v2009_v29 = vpop.f32.mrf.mxu0 }
 0x147   :  { %v2046_v26 = vpop.f32.mrf.mxu3  ;;  %v2034_v27 = vadd.f32 %v2033_v25, %v2021_v24  ;;  %v2022_v30 = vpop.f32.mrf.mxu1  ;;  %v500_v25 = vld [vmem:[%s4019_s3 + $0x78] sm:$0xff]  ;;  %v498_v29 = vld [vmem:[%s4019_s3 + $0x68] sm:$0xff] }
 0x148   :  { %2163 = vmatpush.msra.mxu1 %v500_v25 }
 0x149   :  { %v2047_v31 = vadd.f32 %v2046_v26, %v2034_v27  ;;  %v499_v27 = vld [vmem:[%s4019_s3 + $0x70] sm:$0xff] }
 0x14a   :  { %2164 = vmatpush.msra.mxu1 %v499_v27 }
 0x14b   :  { %v2050_v32 = vmax.f32 %v2047_v31, 0.0  ;;  %v497_v31 = vld [vmem:[%s4019_s3 + $0x60] sm:$0xff] }
 0x14c   :  { %2165 = vmatpush.msra.mxu1 %v498_v29 }
 0x14d   :  { %v2052_v34 = vsel %vm2051_vm3, %v2050_v32, 0.0 }
 0x14e   :  { %v2053_v35 = vrot.slane %v2052_v34, 4  ;;  %v2035_v36 = vpop.f32.mrf.mxu2  ;;  %2166 = vmatpush.msra.mxu1 %v497_v31 }
 0x14f   :  { %v2048_v37 = vpop.f32.mrf.mxu3  ;;  %v495_v36 = vld [vmem:[%s4019_s3 + $0x50] sm:$0xff] }
 0x150   :  { %v2054_v39 = vadd.f32 %v2053_v35, %v2052_v34  ;;  %v496_v34 = vld [vmem:[%s4019_s3 + $0x58] sm:$0xff] }
 0x151   :  { %2167 = vmatpush.msra.mxu1 %v496_v34 }
 0x152   :  { %v2055_v40 = vrot.slane %v2054_v39, 2 }
 0x153   :  { %2168 = vmatpush.msra.mxu1 %v495_v36 }
 0x154   :  { %v2056_v42 = vadd.f32 %v2055_v40, %v2054_v39  ;;  %v493_v40 = vld [vmem:[%s4019_s3 + $0x40] sm:$0xff] }
 0x155   :  { %2169 = vmatpush.msra.mxu1 %v494_v38 }
 0x156   :  { %v2057_v43 = vrot.slane %v2056_v42, 1 }
 0x157   :  { %2170 = vmatpush.msra.mxu1 %v493_v40 }
 0x158   :  { %v2058_v45 = vadd.f32 %v2057_v43, %v2056_v42 }
 0x15a   :  { %v2066_v47 = vmul.f32 %v3933_v44, %v2058_v45 }
 0x15c   :  { %v2067_v49 = vsub.f32 %v2050_v32, %v2066_v47 }
 0x15e   :  { %v2068_v51 = vmul.f32 %v2067_v49, %v2067_v49 }
 0x160   :  { %v2069_v53 = vsel %vm2051_vm3, %v2068_v51, 0.0 }
 0x161   :  { %v2070_v54 = vrot.slane %v2069_v53, 4 }
 0x163   :  { %v2071_v56 = vadd.f32 %v2070_v54, %v2069_v53 }
 0x165   :  { %v2072_v58 = vrot.slane %v2071_v56, 2 }
 0x167   :  { %v2073_v60 = vadd.f32 %v2072_v58, %v2071_v56 }
 0x169   :  { %v2074_v62 = vrot.slane %v2073_v60, 1 }
 0x16b   :  { %v2075_v63 = vadd.f32 %v2074_v62, %v2073_v60 }
 0x16d   :  { %v2076_v0 = vmul.f32 %v2075_v63, %v3933_v44 }
 0x16f   :  { %v2077_v1 = vadd.f32 1e-05, %v2076_v0 }
 0x171   :  { %3183 = vrsqrt.f32 %v2077_v1  ;;  %vm2084_vm6 = vweird.f32 %v2077_v1 }
 0x177   :  { %v3184_v2 = vpop.eup %3183 }
 0x178   :  { %v2079_v3 = vmul.f32 %v3184_v2, %v2077_v1  ;;  %vm2085_vm5 = vweird.f32 %v3184_v2 }
 0x179   :  { %vm2086_vm7 = vmor %vm2084_vm6, %vm2085_vm5 }
 0x17a   :  { %v2080_v4 = vmul.f32 %v3184_v2, %v2079_v3 }
 0x17c   :  { %v2081_v5 = vmul.f32 0.5, %v2080_v4 }
 0x17e   :  { %v2082_v6 = vsub.f32 1.5, %v2081_v5 }
 0x180   :  { %v2083_v7 = vmul.f32 %v3184_v2, %v2082_v6 }
 0x182   :  { %v2087_v9 = vsel %vm2086_vm7, %v3184_v2, %v2083_v7 }
 0x183   :  { %v2088_v10 = vmul.f32 %v2087_v9, %v2067_v49 }
 0x185   :  { %v2090_v12 = vmul.f32 %v3175_v8, %v2088_v10 }
 0x187   :  { %v2092_v13 = vadd.f32 %v3176_v11, %v2090_v12 }
 0x189   :  { %2977 = vmatmul.msk.f32.vlgmr.msra.gmra.mxu0 %vm2051_vm3, %v2092_v13 }
 0x206   :  { %v2114_v15 = vpop.f32.mrf.mxu0 }
 0x207   :  { %v2115_v16 = vadd.f32 %v3177_v14, %v2114_v15 }
 0x209   :  { %v2117_v17 = vmax.f32 %v2115_v16, 0.0 }
 0x20b   :  { %v2118_v18 = vsel %vm2051_vm3, %v2117_v17, 0.0 }
 0x20c   :  { %v2119_v19 = vrot.slane %v2118_v18, 4 }
 0x20e   :  { %v2120_v20 = vadd.f32 %v2119_v19, %v2118_v18 }
 0x210   :  { %v2121_v21 = vrot.slane %v2120_v20, 2 }
 0x212   :  { %v2122_v22 = vadd.f32 %v2121_v21, %v2120_v20 }
 0x214   :  { %v2123_v23 = vrot.slane %v2122_v22, 1 }
 0x216   :  { %v2124_v24 = vadd.f32 %v2123_v23, %v2122_v22 }
 0x218   :  { %v2125_v26 = vmul.f32 %v2124_v24, %v3933_v44 }
 0x21a   :  { %v2126_v28 = vsub.f32 %v2117_v17, %v2125_v26 }
 0x21c   :  { %v2127_v30 = vmul.f32 %v2126_v28, %v2126_v28 }
 0x21e   :  { %v2128_v32 = vsel %vm2051_vm3, %v2127_v30, 0.0 }
 0x21f   :  { %v2129_v33 = vrot.slane %v2128_v32, 4 }
 0x221   :  { %v2130_v35 = vadd.f32 %v2129_v33, %v2128_v32 }
 0x223   :  { %v2131_v37 = vrot.slane %v2130_v35, 2 }
 0x225   :  { %v2132_v39 = vadd.f32 %v2131_v37, %v2130_v35 }
 0x227   :  { %v2133_v41 = vrot.slane %v2132_v39, 1 }
 0x229   :  { %v2134_v42 = vadd.f32 %v2133_v41, %v2132_v39 }
 0x22b   :  { %v2135_v43 = vmul.f32 %v2134_v42, %v3933_v44  ;;  %v3179_v44 = vld [vmem:[%s4018_s2 + $0x5] ss:$0 sm:$0xff]  ;;  %s3219_s2 = smov [#allocation3]  }
 0x22c   :  { %s2198_s17 = sshll.u32 %s3219_s2, 4  ;;  %s2199_s17 = int_to_ptr.vmem [resolvable:$true] %s2198_s17 }
 0x22d   :  { %v2136_v45 = vadd.f32 1e-05, %v2135_v43 }
 0x22f   :  { %3185 = vrsqrt.f32 %v2136_v45  ;;  %vm2143_vm9 = vweird.f32 %v2136_v45 }
 0x235   :  { %v3186_v46 = vpop.eup %3185 }
 0x236   :  { %v2138_v47 = vmul.f32 %v3186_v46, %v2136_v45  ;;  %vm2144_vm8 = vweird.f32 %v3186_v46 }
 0x237   :  { %vm2145_vm10 = vmor %vm2143_vm9, %vm2144_vm8 }
 0x238   :  { %v2139_v48 = vmul.f32 %v3186_v46, %v2138_v47 }
 0x23a   :  { %v2140_v49 = vmul.f32 0.5, %v2139_v48 }
 0x23c   :  { %v2141_v50 = vsub.f32 1.5, %v2140_v49 }
 0x23e   :  { %v2142_v51 = vmul.f32 %v3186_v46, %v2141_v50 }
 0x240   :  { %v2146_v53 = vsel %vm2145_vm10, %v3186_v46, %v2142_v51 }
 0x241   :  { %v2147_v54 = vmul.f32 %v2146_v53, %v2126_v28 }
 0x243   :  { %v2149_v55 = vmul.f32 %v3178_v52, %v2147_v54 }
 0x245   :  { %v2151_v56 = vadd.f32 %v3179_v44, %v2149_v55 }
 0x247   :  { %2978 = vmatmul.msk.f32.vlgmr.msra.gmra.mxu1 %vm2051_vm3, %v2151_v56 }
 0x2c4   :  { %v2172_v58 = vpop.f32.mrf.mxu1 }
 0x2c5   :  { %v2176_v59 = vadd.f32 %v3180_v57, %v2172_v58 }
 0x2c7   :  { %v2178_v60 = vsel %vm2177_vm11, %v2176_v59, -inf }
 0x2c8   :  { %2179 = vmax.xlane.f32.xlu0 %v2178_v60 }
 0x33b   :  { %v2180_v61 = vpop.xlane.xlu0 %2179 }
 0x33c   :  { %v2181_v62 = vsub.f32 %v2176_v59, %v2180_v61 }
 0x33e   :  { %v2182_v63 = vmul.f32 1.442695, %v2181_v62 }
 0x340   :  { %3187 = vpow2.f32 %v2182_v63 }
 0x346   :  { %v3188_v0 = vpop.eup %3187 }
 0x347   :  { %v2184_v1 = vsel %vm2177_vm11, %v3188_v0, 0.0 }
 0x348   :  { %2185 = vadd.xlane.f32.xlu0 %v2184_v1 }
 0x3bb   :  { %v2186_v2 = vpop.xlane.xlu0 %2185 }
 0x3bc   :  { %3189 = vrcp.f32 %v2186_v2 }
 0x3c2   :  { %v3190_v3 = vpop.eup %3189 }
 0x3c3   :  { %v2188_v4 = vmul.f32 %v3190_v3, %v2186_v2 }
 0x3c5   :  { %v2189_v5 = vsub.f32 2.0, %v2188_v4 }
 0x3c7   :  { %v2190_v6 = vmul.f32 %v3190_v3, %v2189_v5 }
 0x3c9   :  { %v2191_v7 = vmul.f32 %v3188_v0, %v2190_v6 }
 0x3cb   :  { %2192 = vst.msk [vmem:[#allocation3] sm:$0xff] %vm2177_vm11, %v2191_v7 }
 0x3cc   :  { %2203 = dma.vmem_to_hbm [thread:$0]  %s2199_s17, 128, %s2201_s20, [#allocation4]  }
 0x3cd   :  { %3215 = dma.done.wait [#allocation4], 128  }
 0x3ce   :  { %3216 = vsyncadd [#allocation4], 4294967168 }
 0x3cf   :  { %2208 = vsyncpa [#allocation4], 1 }

</bundles_post_ra>
